<compile_context>
chip_gen: v5e
topology: v5e:2x2
jax: 0.10.0
libtpu: 0.0.40
codegen_flags: <defaults>
</compile_context>

<pallas_src>
import jax
import jax.numpy as jnp
from jax.experimental import pallas as pl
from jax.experimental.pallas import tpu as pltpu


_SUBLANE = {4: 8, 2: 16, 1: 32}  # minimum sublane tile per dtype itemsize


def _out_double_buffer_budget_bytes():
    """VMEM budget for the double-buffered output block.

    Kept <= 8 MiB so it fits the default scoped-VMEM limit on every current
    generation (16 MiB on v5e, 32 MiB on v6e/v7x) without any flags, and is
    derived from the reported VMEM capacity so it scales down automatically if
    a future chip shrinks VMEM further.
    """
    try:
        cap = pltpu.get_tpu_info().vmem_capacity_bytes
    except Exception:  # interpret mode / older runtimes
        cap = 64 << 20  # assume the smallest (v7x per-core) capacity
    return min(8 << 20, cap // 8)


def _pick_batch_tile(batch, horizon, itemsize):
    """Largest sublane-aligned batch tile whose (tb, H) output block fits VMEM."""
    sub = _SUBLANE.get(itemsize, 8)
    if batch <= sub:
        return batch  # one full-batch block (full-dim blocks are always legal)

    budget = _out_double_buffer_budget_bytes()
    cap = budget // (2 * max(horizon, 1) * itemsize)  # rows per block by VMEM
    cap = min(cap, 1024, batch)                       # 512-1024 rows ~ HBM roofline
    cap = max(sub, (cap // sub) * sub)

    # Prefer an aligned tile that divides the batch exactly (bounded search);
    # otherwise keep the capped tile and let the pipeline mask the ragged last
    # output block.
    tb = cap
    for cand in range(cap, max(sub - 1, cap - 64 * sub), -sub):
        if batch % cand == 0:
            tb = cand
            break

    # Guarantee >= 2 grid steps so ("parallel",) can shard blocks across the
    # two TensorCores on v7x (free for this store-bound kernel).
    if pl.cdiv(batch, tb) < 2:
        tb = max(sub, ((tb // 2) // sub) * sub)
    return tb


def _make_broadcast_kernel(tb, resident_input):
    if resident_input:
        def kernel(last_ref, o_ref):
            # last_ref: (Bpad, 1) resident in VMEM; o_ref: (tb, H) block.
            row0 = pl.multiple_of(pl.program_id(0) * tb, tb)
            vals = last_ref[pl.ds(row0, tb), :]           # (tb, 1)
            o_ref[...] = jnp.broadcast_to(vals, o_ref.shape)
    else:
        def kernel(last_ref, o_ref):
            # last_ref: (tb, 1) block; o_ref: (tb, H) block.
            o_ref[...] = jnp.broadcast_to(last_ref[...], o_ref.shape)
    return kernel


def naive_model_forward(x, forecast_horizon=1, *, force_pallas=False):
    """x: (B, S, F) -> (B, forecast_horizon); out[b, t] = x[b, -1, -1]."""
    B, _, _ = x.shape
    H = int(forecast_horizon)
    itemsize = jnp.dtype(x.dtype).itemsize

    # Grab exactly the B scalars we need in plain JAX (tiny fused slice), so
    # the kernel never touches the full (B, S, F) tensor.
    last = x[:, -1, -1:]                                   # (B, 1)

    # H == 1 is just a reshape of `last`, and tiny B*H outputs are dominated by
    # the fixed per-step pallas_call overhead and masked sub-128-lane stores,
    # so plain XLA broadcast is strictly better there.
    if not force_pallas and (H == 1 or B * H * itemsize <= (1 << 20)):
        return jnp.broadcast_to(last, (B, H))

    tb = _pick_batch_tile(B, H, itemsize)
    grid = (pl.cdiv(B, tb),)
    b_pad = grid[0] * tb

    # Keep the whole "last" vector VMEM-resident (constant index_map) so we do
    # NOT re-issue a 1-lane-wide DMA sliver per grid step; pad it so the
    # in-kernel pl.ds slice is always in bounds.  For huge batches fall back to
    # per-block slivers to keep the resident VMEM footprint negligible.
    resident_input = b_pad * itemsize <= (1 << 20)
    if b_pad > B:
        last = jnp.pad(last, ((0, b_pad - B), (0, 0)))

    if resident_input:
        in_spec = pl.BlockSpec((b_pad, 1), lambda i: (0, 0))
    else:
        in_spec = pl.BlockSpec((tb, 1), lambda i: (i, 0))

    return pl.pallas_call(
        _make_broadcast_kernel(tb, resident_input),
        out_shape=jax.ShapeDtypeStruct((B, H), x.dtype),
        grid=grid,
        in_specs=[in_spec],
        out_specs=pl.BlockSpec((tb, H), lambda i: (i, 0)),
        compiler_params=pltpu.CompilerParams(
            dimension_semantics=("parallel",),
        ),
    )(last)


def init_params(key):
    """Deterministic init of the (unused-in-forward) fc = nn.Linear(8, 1)."""
    k_w, k_b = jax.random.split(key)
    bound = 1.0 / jnp.sqrt(8.0)
    w = jax.random.uniform(k_w, (1, 8), jnp.float32, -bound, bound)
    b = jax.random.uniform(k_b, (1,), jnp.float32, -bound, bound)
    return {"fc_w": w, "fc_b": b}  # kept for fidelity; not used in forward


def _ref(x, h):
    return jnp.repeat(x[:, -1, -1][:, None], h, axis=1)


if __name__ == "__main__":
    key = jax.random.PRNGKey(0)
    k1, k2, k3, kp = jax.random.split(key, 4)
    _params = init_params(kp)  # deterministic, unused in forward (matches PyTorch)

    # 1) Module-default small shapes (Linear(8,1) implies feature dim 8), H=1.
    #    force_pallas=True so the kernel itself is compiled & run even though
    #    the production path would bypass Pallas for this tiny output.
    b1, s1, f1, h1 = 2, 8, 8, 1
    x1 = jax.random.normal(k1, (b1, s1, f1), dtype=jnp.float32)
    out1 = jax.block_until_ready(naive_model_forward(x1, h1, force_pallas=True))
    assert out1.shape == (b1, h1)
    assert jnp.allclose(out1, _ref(x1, h1)), (out1, _ref(x1, h1))
    # Production (auto-bypass) path gives the same answer.
    out1_auto = jax.block_until_ready(naive_model_forward(x1, h1))
    assert jnp.allclose(out1_auto, _ref(x1, h1))

    # 2) Sublane-aligned batch split: B=16 -> tb=8, grid=(2,) (TC-shardable),
    #    H=4, resident-input path.
    b2, s2, f2, h2 = 16, 8, 8, 4
    x2 = jax.random.normal(k2, (b2, s2, f2), dtype=jnp.float32)
    out2 = jax.block_until_ready(naive_model_forward(x2, h2, force_pallas=True))
    assert out2.shape == (b2, h2)
    assert jnp.allclose(out2, _ref(x2, h2)), (out2, _ref(x2, h2))

    # 3) Awkward batch (12, not a multiple of 8) + lane-dense horizon (128):
    #    exercises the cdiv grid with a masked ragged last output block and
    #    host-side padding of the resident input.
    b3, s3, f3, h3 = 12, 8, 8, 128
    x3 = jax.random.normal(k3, (b3, s3, f3), dtype=jnp.float32)
    out3 = jax.block_until_ready(naive_model_forward(x3, h3, force_pallas=True))
    assert out3.shape == (b3, h3)
    assert jnp.allclose(out3, _ref(x3, h3)), (out3, _ref(x3, h3))

    print("KERNEL_OK")
</pallas_src>

<mosaic_0001>
module attributes {stable_mosaic.version = 11 : i64} {
  func.func @kernel(%arg0: i32, %arg1: memref<2x1xf32, #tpu.memory_space<vmem>>, %arg2: memref<2x1xf32, #tpu.memory_space<vmem>>) attributes {dimension_semantics = [#tpu.dimension_semantics<parallel>], iteration_bounds = array<i64: 1>, scalar_prefetch = 0 : i64, scratch_operands = 0 : i64, tpu.core_type = #tpu.core_type<tc>, window_params = [{pipeline_mode = #tpu.pipeline_mode<synchronous>, transform_indices = @transform_0, window_bounds = array<i64: 2, 1>}, {transform_indices = @transform_1, window_bounds = array<i64: 2, 1>}]} {
    %c2_i32 = arith.constant 2 : i32
    %0 = arith.muli %arg0, %c2_i32 : i32
    %1 = tpu.assume_multiple %0, 2 : i32
    %2 = arith.index_cast %1 : i32 to index
    %c0 = arith.constant 0 : index
    %3 = vector.load %arg1[%2, %c0] : memref<2x1xf32, #tpu.memory_space<vmem>>, vector<2x1xf32>
    %c0_0 = arith.constant 0 : index
    %c0_1 = arith.constant 0 : index
    %4 = vector.load %arg2[%c0_0, %c0_1] : memref<2x1xf32, #tpu.memory_space<vmem>>, vector<2x1xf32>
    tpu.vector_store %arg2[%c0_0, %c0_1], %3 {strides = array<i32>} : memref<2x1xf32, #tpu.memory_space<vmem>>, vector<2x1xf32>,
    return
  }
  func.func @transform_0(%arg0: i32) -> (i32, i32) {
    %c0_i32 = arith.constant 0 : i32
    %c0_i32_0 = arith.constant 0 : i32
    %c0_i32_1 = arith.constant 0 : i32
    return %c0_i32, %c0_i32_0 : i32, i32
  }
  func.func @transform_1(%arg0: i32) -> (i32, i32) {
    %c0_i32 = arith.constant 0 : i32
    %c0_i32_0 = arith.constant 0 : i32
    return %arg0, %c0_i32 : i32, i32
  }
}

</mosaic_0001>

<bundles_post_ra>
// kernel: tpu_custom_call.1
= control target key start
LH: loop header
LB: loop body
LE: loop exit
PB: predicated region body
PF: predicated region fallthrough
CT: control target
= control target key end

     0   :  { %vm11_vm0 = vcmask 1024   ;;  %s33_s0 = inlined_call_operand.vmem [shape: f32[2,1], index: 0, kind: input, shape index: {}]   ;;  %s34_s1 = inlined_call_operand.vmem [shape: f32[2,1], index: 1, kind: output, shape index: {}]  }
   0x1   :  { %v10_v0 = vld [vmem:[%s33_s0] sm:$0x3] }
   0x2   :  { %12 = vst.msk [vmem:[%s34_s1] sm:$0x3] %vm11_vm0, %v10_v0 }

</bundles_post_ra>
